<compile_context>
chip_gen: v5e
topology: v5e:2x2
jax: 0.10.0
libtpu: 0.0.40
codegen_flags: <defaults>
</compile_context>

<pallas_src>
import functools

import jax
import jax.numpy as jnp
from jax import lax
from jax.experimental import pallas as pl
from jax.experimental.pallas import tpu as pltpu


def _round_up(x, m):
    return (x + m - 1) // m * m


def _nbow_kernel(ids_ref, emb_ref, w_ref, b_ref, out_ref, *, inv_seq):
    """One batch tile: (TB, S) ids -> (TB, C_pad) logits."""
    tb, seq_len = ids_ref.shape
    vocab = emb_ref.shape[0]

    # vocab_iota[r, v] = v  (vocab id along the lane axis)
    vocab_iota = lax.broadcasted_iota(jnp.int32, (tb, vocab), 1)

    ids = ids_ref[...]  # (TB, S) int32, one load

    # Build token-count matrix counts[r, v] with full-width vreg compare+adds.
    # S is known statically -> static unroll (no per-token grid steps / DMAs).
    counts = jnp.zeros((tb, vocab), dtype=jnp.float32)
    for s in range(seq_len):
        tok = ids[:, s:s + 1]                                   # (TB, 1)
        counts = counts + (tok == vocab_iota).astype(jnp.float32)

    # sum_s emb[ids[r, s]]  ==  counts @ emb_table   (single MXU pass per tile)
    emb = emb_ref[...]                                          # (V, D), VMEM-resident
    summed = jnp.dot(counts.astype(emb.dtype), emb,
                     preferred_element_type=jnp.float32)        # (TB, D)
    mean = summed * inv_seq                                     # one scale per tile

    # fc: (TB, D) @ (D, C_pad) + bias   -> lane-dense (TB, C_pad) store
    out_ref[...] = (
        jnp.dot(mean.astype(w_ref.dtype), w_ref[...],
                preferred_element_type=jnp.float32)
        + b_ref[...].astype(jnp.float32)
    ).astype(out_ref.dtype)


def nbow_forward(ids, emb_table, w_t, bias, *, batch_tile=128):
    """ids: (B, S) int; emb_table: (V, D) f32; w_t: (D, C) f32 (= fc.weight.T); bias: (C,) f32."""
    ids = ids.astype(jnp.int32)
    B, S = ids.shape
    V, D = emb_table.shape
    C = w_t.shape[1]

    # Lane-dense output: pad class dim to a multiple of 128 (sliced off below).
    c_pad = _round_up(C, 128)
    w_pad = jnp.zeros((D, c_pad), w_t.dtype).at[:, :C].set(w_t)
    b_pad = jnp.zeros((1, c_pad), jnp.float32).at[:, :C].set(
        bias.reshape(1, C).astype(jnp.float32))

    # Sublane-dense batch tiles (128 rows per tile, clamped for small B).
    tb = min(batch_tile, _round_up(B, 8))
    b_padded = _round_up(B, tb)
    ids_pad = jnp.zeros((b_padded, S), jnp.int32).at[:B, :].set(ids)

    kernel = functools.partial(_nbow_kernel, inv_seq=1.0 / S)

    out = pl.pallas_call(
        kernel,
        out_shape=jax.ShapeDtypeStruct((b_padded, c_pad), jnp.float32),
        grid=(b_padded // tb,),
        in_specs=[
            # (TB, S) block of token ids per grid step
            pl.BlockSpec((tb, S), lambda i: (i, 0)),
            # embedding table, resident in VMEM across the whole grid
            pl.BlockSpec((V, D), lambda i: (0, 0)),
            # padded fc weight / bias, resident
            pl.BlockSpec((D, c_pad), lambda i: (0, 0)),
            pl.BlockSpec((1, c_pad), lambda i: (0, 0)),
        ],
        out_specs=pl.BlockSpec((tb, c_pad), lambda i: (i, 0)),
        compiler_params=pltpu.CompilerParams(
            dimension_semantics=("parallel",),
        ),
    )(ids_pad, emb_table, w_pad, b_pad)

    return out[:B, :C]


if __name__ == "__main__":
    # Small shapes consistent with the module's forward.
    VOCAB, EMBED_DIM, NUM_CLASSES, PAD_INDEX = 64, 32, 8, 0
    B, S = 2, 8

    key = jax.random.PRNGKey(0)
    k_emb, k_w, k_b, k_ids = jax.random.split(key, 4)

    emb_table = 0.1 * jax.random.normal(k_emb, (VOCAB, EMBED_DIM), jnp.float32)
    # nn.Embedding(padding_idx=...) forward semantics: the padding row is zero.
    emb_table = emb_table.at[PAD_INDEX].set(0.0)

    w_t = 0.1 * jax.random.normal(k_w, (EMBED_DIM, NUM_CLASSES), jnp.float32)  # (D, C)
    bias = 0.1 * jax.random.normal(k_b, (NUM_CLASSES,), jnp.float32)

    ids = jax.random.randint(k_ids, (B, S), 0, VOCAB, dtype=jnp.int32)
    ids = ids.at[:, -2:].set(PAD_INDEX)  # include some padding tokens

    out = nbow_forward(ids, emb_table, w_t, bias)
    out = jax.block_until_ready(out)

    # Pure-JAX reference.
    ref = jnp.take(emb_table, ids, axis=0).mean(axis=1) @ w_t + bias
    assert out.shape == (B, NUM_CLASSES)
    assert jnp.allclose(out, ref, atol=1e-5, rtol=1e-5), float(jnp.max(jnp.abs(out - ref)))

    print("KERNEL_OK")
</pallas_src>

<mosaic_0001>
module attributes {stable_mosaic.version = 11 : i64} {
  func.func @_nbow_kernel(%arg0: i32, %arg1: memref<8x8xi32, #tpu.memory_space<vmem>>, %arg2: memref<64x32xf32, #tpu.memory_space<vmem>>, %arg3: memref<32x128xf32, #tpu.memory_space<vmem>>, %arg4: memref<1x128xf32, #tpu.memory_space<vmem>>, %arg5: memref<8x128xf32, #tpu.memory_space<vmem>>) attributes {dimension_semantics = [#tpu.dimension_semantics<parallel>], iteration_bounds = array<i64: 1>, scalar_prefetch = 0 : i64, scratch_operands = 0 : i64, tpu.core_type = #tpu.core_type<tc>, window_params = [{transform_indices = @transform_0, window_bounds = array<i64: 8, 8>}, {pipeline_mode = #tpu.pipeline_mode<synchronous>, transform_indices = @transform_1, window_bounds = array<i64: 64, 32>}, {pipeline_mode = #tpu.pipeline_mode<synchronous>, transform_indices = @transform_2, window_bounds = array<i64: 32, 128>}, {pipeline_mode = #tpu.pipeline_mode<synchronous>, transform_indices = @transform_3, window_bounds = array<i64: 1, 128>}, {transform_indices = @transform_4, window_bounds = array<i64: 8, 128>}]} {
    %0 = tpu.iota {dimensions = array<i32: 1>} : vector<8x64xi32>
    %c0 = arith.constant 0 : index
    %c0_0 = arith.constant 0 : index
    %1 = vector.load %arg1[%c0, %c0_0] : memref<8x8xi32, #tpu.memory_space<vmem>>, vector<8x8xi32>
    %cst = arith.constant 0.000000e+00 : f32
    %2 = vector.broadcast %cst : f32 to vector<8x64xf32>
    %3 = vector.extract_strided_slice %1 {offsets = [0, 0], sizes = [8, 1], strides = [1, 1]} : vector<8x8xi32> to vector<8x1xi32>
    %4 = vector.broadcast %3 : vector<8x1xi32> to vector<8x64xi32>
    %5 = arith.cmpi eq, %4, %0 : vector<8x64xi32>
    %6 = arith.extui %5 : vector<8x64xi1> to vector<8x64xi32>
    %7 = arith.sitofp %6 : vector<8x64xi32> to vector<8x64xf32>
    %8 = arith.addf %2, %7 : vector<8x64xf32>
    %9 = vector.extract_strided_slice %1 {offsets = [0, 1], sizes = [8, 1], strides = [1, 1]} : vector<8x8xi32> to vector<8x1xi32>
    %10 = vector.broadcast %9 : vector<8x1xi32> to vector<8x64xi32>
    %11 = arith.cmpi eq, %10, %0 : vector<8x64xi32>
    %12 = arith.extui %11 : vector<8x64xi1> to vector<8x64xi32>
    %13 = arith.sitofp %12 : vector<8x64xi32> to vector<8x64xf32>
    %14 = arith.addf %8, %13 : vector<8x64xf32>
    %15 = vector.extract_strided_slice %1 {offsets = [0, 2], sizes = [8, 1], strides = [1, 1]} : vector<8x8xi32> to vector<8x1xi32>
    %16 = vector.broadcast %15 : vector<8x1xi32> to vector<8x64xi32>
    %17 = arith.cmpi eq, %16, %0 : vector<8x64xi32>
    %18 = arith.extui %17 : vector<8x64xi1> to vector<8x64xi32>
    %19 = arith.sitofp %18 : vector<8x64xi32> to vector<8x64xf32>
    %20 = arith.addf %14, %19 : vector<8x64xf32>
    %21 = vector.extract_strided_slice %1 {offsets = [0, 3], sizes = [8, 1], strides = [1, 1]} : vector<8x8xi32> to vector<8x1xi32>
    %22 = vector.broadcast %21 : vector<8x1xi32> to vector<8x64xi32>
    %23 = arith.cmpi eq, %22, %0 : vector<8x64xi32>
    %24 = arith.extui %23 : vector<8x64xi1> to vector<8x64xi32>
    %25 = arith.sitofp %24 : vector<8x64xi32> to vector<8x64xf32>
    %26 = arith.addf %20, %25 : vector<8x64xf32>
    %27 = vector.extract_strided_slice %1 {offsets = [0, 4], sizes = [8, 1], strides = [1, 1]} : vector<8x8xi32> to vector<8x1xi32>
    %28 = vector.broadcast %27 : vector<8x1xi32> to vector<8x64xi32>
    %29 = arith.cmpi eq, %28, %0 : vector<8x64xi32>
    %30 = arith.extui %29 : vector<8x64xi1> to vector<8x64xi32>
    %31 = arith.sitofp %30 : vector<8x64xi32> to vector<8x64xf32>
    %32 = arith.addf %26, %31 : vector<8x64xf32>
    %33 = vector.extract_strided_slice %1 {offsets = [0, 5], sizes = [8, 1], strides = [1, 1]} : vector<8x8xi32> to vector<8x1xi32>
    %34 = vector.broadcast %33 : vector<8x1xi32> to vector<8x64xi32>
    %35 = arith.cmpi eq, %34, %0 : vector<8x64xi32>
    %36 = arith.extui %35 : vector<8x64xi1> to vector<8x64xi32>
    %37 = arith.sitofp %36 : vector<8x64xi32> to vector<8x64xf32>
    %38 = arith.addf %32, %37 : vector<8x64xf32>
    %39 = vector.extract_strided_slice %1 {offsets = [0, 6], sizes = [8, 1], strides = [1, 1]} : vector<8x8xi32> to vector<8x1xi32>
    %40 = vector.broadcast %39 : vector<8x1xi32> to vector<8x64xi32>
    %41 = arith.cmpi eq, %40, %0 : vector<8x64xi32>
    %42 = arith.extui %41 : vector<8x64xi1> to vector<8x64xi32>
    %43 = arith.sitofp %42 : vector<8x64xi32> to vector<8x64xf32>
    %44 = arith.addf %38, %43 : vector<8x64xf32>
    %45 = vector.extract_strided_slice %1 {offsets = [0, 7], sizes = [8, 1], strides = [1, 1]} : vector<8x8xi32> to vector<8x1xi32>
    %46 = vector.broadcast %45 : vector<8x1xi32> to vector<8x64xi32>
    %47 = arith.cmpi eq, %46, %0 : vector<8x64xi32>
    %48 = arith.extui %47 : vector<8x64xi1> to vector<8x64xi32>
    %49 = arith.sitofp %48 : vector<8x64xi32> to vector<8x64xf32>
    %50 = arith.addf %44, %49 : vector<8x64xf32>
    %c0_1 = arith.constant 0 : index
    %c0_2 = arith.constant 0 : index
    %51 = vector.load %arg2[%c0_1, %c0_2] : memref<64x32xf32, #tpu.memory_space<vmem>>, vector<64x32xf32>
    %cst_3 = arith.constant dense<0.000000e+00> : vector<8x32xf32>
    %52 = tpu.matmul %50, %51, %cst_3 {dimension_numbers = #tpu.dot_dimension_numbers<[1], [0], [0], [1], [0, 0, 1, 1], [], []>} : vector<8x64xf32>, vector<64x32xf32>, vector<8x32xf32> -> vector<8x32xf32>
    %cst_4 = arith.constant 1.250000e-01 : f32
    %53 = vector.broadcast %cst_4 : f32 to vector<8x32xf32>
    %54 = arith.mulf %52, %53 : vector<8x32xf32>
    %c0_5 = arith.constant 0 : index
    %c0_6 = arith.constant 0 : index
    %55 = vector.load %arg3[%c0_5, %c0_6] : memref<32x128xf32, #tpu.memory_space<vmem>>, vector<32x128xf32>
    %cst_7 = arith.constant dense<0.000000e+00> : vector<8x128xf32>
    %56 = tpu.matmul %54, %55, %cst_7 {dimension_numbers = #tpu.dot_dimension_numbers<[1], [0], [0], [1], [0, 0, 1, 1], [], []>} : vector<8x32xf32>, vector<32x128xf32>, vector<8x128xf32> -> vector<8x128xf32>
    %c0_8 = arith.constant 0 : index
    %c0_9 = arith.constant 0 : index
    %57 = vector.load %arg4[%c0_8, %c0_9] : memref<1x128xf32, #tpu.memory_space<vmem>>, vector<1x128xf32>
    %58 = vector.broadcast %57 : vector<1x128xf32> to vector<8x128xf32>
    %59 = arith.addf %56, %58 : vector<8x128xf32>
    %c0_10 = arith.constant 0 : index
    %c0_11 = arith.constant 0 : index
    %60 = vector.load %arg5[%c0_10, %c0_11] : memref<8x128xf32, #tpu.memory_space<vmem>>, vector<8x128xf32>
    tpu.vector_store %arg5[%c0_10, %c0_11], %59 {strides = array<i32>} : memref<8x128xf32, #tpu.memory_space<vmem>>, vector<8x128xf32>,
    return
  }
  func.func @transform_0(%arg0: i32) -> (i32, i32) {
    %c0_i32 = arith.constant 0 : i32
    %c0_i32_0 = arith.constant 0 : i32
    return %arg0, %c0_i32 : i32, i32
  }
  func.func @transform_1(%arg0: i32) -> (i32, i32) {
    %c0_i32 = arith.constant 0 : i32
    %c0_i32_0 = arith.constant 0 : i32
    %c0_i32_1 = arith.constant 0 : i32
    return %c0_i32, %c0_i32_0 : i32, i32
  }
  func.func @transform_2(%arg0: i32) -> (i32, i32) {
    %c0_i32 = arith.constant 0 : i32
    %c0_i32_0 = arith.constant 0 : i32
    %c0_i32_1 = arith.constant 0 : i32
    return %c0_i32, %c0_i32_0 : i32, i32
  }
  func.func @transform_3(%arg0: i32) -> (i32, i32) {
    %c0_i32 = arith.constant 0 : i32
    %c0_i32_0 = arith.constant 0 : i32
    %c0_i32_1 = arith.constant 0 : i32
    return %c0_i32, %c0_i32_0 : i32, i32
  }
  func.func @transform_4(%arg0: i32) -> (i32, i32) {
    %c0_i32 = arith.constant 0 : i32
    %c0_i32_0 = arith.constant 0 : i32
    return %arg0, %c0_i32 : i32, i32
  }
}

</mosaic_0001>

<bundles_post_ra>
// kernel: tpu_custom_call.1
= control target key start
LH: loop header
LB: loop body
LE: loop exit
PB: predicated region body
PF: predicated region fallthrough
CT: control target
= control target key end

     0   :  { %v215_v1 = vmov 0   ;;  %v216_v2 = vmov 2   ;;  %s295_s0 = inlined_call_operand.vmem [shape: s32[8,8], index: 0, kind: input, shape index: {}]   ;;  %s296_s1 = inlined_call_operand.vmem [shape: f32[64,32], index: 1, kind: input, shape index: {}]   ;;  %s297_s2 = inlined_call_operand.vmem [shape: f32[32,128], index: 2, kind: input, shape index: {}]   ;;  %s298_s3 = inlined_call_operand.vmem [shape: f32[1,128], index: 3, kind: input, shape index: {}]   ;;  %s299_s4 = inlined_call_operand.hbm [shape: f32[8,128], index: 4, kind: output, shape index: {}]  }
   0x1   :  { %v20_v0 = vld [vmem:[%s295_s0] sm:$0xff]  ;;  %179 = vset.pattern.permute.xlu0 %v215_v1  ;;  %181 = vset.pattern.permute.xlu1 %v216_v2 }
   0x2   :  { %22 = vperm.xlu0 %179, %v20_v0   ;;  %36 = vperm.xlu1 %181, %v20_v0  }
   0x3   :  { %9 = vsyncpa [#allocation3], 0  ;;  %v217_v3 = vmov 4   ;;  %v218_v4 = vmov 1   ;;  %v219_v5 = vmov 3   ;;  %v220_v6 = vmov 5  }
   0x4   :  { %183 = vset.pattern.permute.xlu2 %v217_v3  ;;  %v221_v7 = vmov 6   ;;  %v222_v8 = vmov 7   ;;  %v84_v9 = vld [vmem:[%s296_s1 + $0x38] sm:$0xff]  ;;  %v83_v10 = vld [vmem:[%s296_s1 + $0x30] sm:$0xff]  ;;  %v82_v11 = vld [vmem:[%s296_s1 + $0x28] sm:$0xff]  ;;  %v18_v21 = vlaneseq  ;;  %v223_v27 = vmov 0.0  }
   0x5   :  { %50 = vperm.xlu2 %183, %v20_v0   ;;  %97 = vmatpush.msra.mxu0 %v84_v9  ;;  %v81_v12 = vld [vmem:[%s296_s1 + $0x20] sm:$0xff]  ;;  %v80_v13 = vld [vmem:[%s296_s1 + $0x18] sm:$0xff]  ;;  %v79_v14 = vld [vmem:[%s296_s1 + $0x10] sm:$0xff]  ;;  %vm85_vm8 = vcmask 523264   ;;  %vm118_vm9 = vcmask 261120   ;;  %s224_s15 = smov [#allocation2]  }
   0x6   :  { %v78_v15 = vld [vmem:[%s296_s1 + $0x8] sm:$0xff]  ;;  %v77_v16 = vld [vmem:[%s296_s1] sm:$0xff]  ;;  %v113_v17 = vld [vmem:[%s297_s2 + $0x18] sm:$0xff]  ;;  %v19_v23 = vand.u32 127, %v18_v21  ;;  %s148_s16 = sshll.u32 %s224_s15, 4  ;;  %s150_s18 = sshll.u32 %s299_s4, 4  ;;  %s149_s16 = int_to_ptr.vmem [resolvable:$true] %s148_s16  ;;  %s151_s18 = int_to_ptr.hbm [resolvable:$true] %s150_s18 }
   0x7   :  { %98 = vmatpush.msra.mxu0 %v83_v10  ;;  %v112_v18 = vld [vmem:[%s297_s2 + $0x10] sm:$0xff]  ;;  %134 = vmatpush.msra.mxu1 %v113_v17  ;;  %v111_v45 = vld [vmem:[%s297_s2 + $0x8] sm:$0xff]  ;;  %v110_v46 = vld [vmem:[%s297_s2] sm:$0xff] }
   0x8   :  { %v188_v49 = vld [vmem:[%s298_s3] ss:$0 sm:$0xff] }
   0x9   :  { %99 = vmatpush.msra.mxu0 %v82_v11  ;;  %135 = vmatpush.msra.mxu1 %v112_v18 }
   0xa   :  { %180 = vset.pattern.permute.xlu0 %v218_v4  ;;  %182 = vset.pattern.permute.xlu1 %v219_v5 }
   0xb   :  { %29 = vperm.xlu0 %180, %v20_v0   ;;  %43 = vperm.xlu1 %182, %v20_v0  }
   0xc   :  { %100 = vmatpush.msra.mxu0 %v81_v12  ;;  %136 = vmatpush.msra.mxu1 %v111_v45 }
   0xd   :  { %184 = vset.pattern.permute.xlu2 %v220_v6 }
   0xe   :  { %57 = vperm.xlu2 %184, %v20_v0   ;;  %101 = vmatpush.msra.mxu0 %v80_v13 }
   0xf   :  { %137 = vmatpush.msra.mxu1 %v110_v46 }
  0x10   :  { %102 = vmatpush.msra.mxu0 %v79_v14 }
  0x12   :  { %103 = vmatpush.msra.mxu0 %v78_v15 }
  0x13   :  { %185 = vset.pattern.permute.xlu1 %v221_v7  ;;  %187 = vset.pattern.permute.xlu0 %v222_v8 }
  0x14   :  { %64 = vperm.xlu1 %185, %v20_v0   ;;  %104 = vmatpush.msra.mxu0 %v77_v16 }
  0x16   :  { %186 = vset.pattern.permute.xlu2 %v222_v8 }
  0x17   :  { %71 = vperm.xlu2 %186, %v20_v0  }
  0x5f   :  { %v51_v19 = vpop.permute.xlu2 %50 }
  0x60   :  { %vm52_vm4 = vcmp.eq.s32.totalorder %v51_v19, %v19_v23 }
  0x61   :  { %v163_v36 = vsel %vm52_vm4, 1.0, %v223_v27 }
  0x68   :  { %v58_v24 = vpop.permute.xlu2 %57 }
  0x69   :  { %vm59_vm5 = vcmp.eq.s32.totalorder %v58_v24, %v19_v23 }
  0x6a   :  { %v164_v39 = vsel %vm59_vm5, 1.0, %v223_v27 }
  0x71   :  { %v72_v34 = vpop.permute.xlu2 %71 }
  0x72   :  { %vm73_vm6 = vcmp.eq.s32.totalorder %v72_v34, %v19_v23 }
  0x73   :  { %v166_v42 = vsel %vm73_vm6, 1.0, %v223_v27 }
  0x74   :  { %v23_v20 = vpop.permute.xlu0 %22  ;;  %v37_v22 = vpop.permute.xlu1 %36 }
  0x75   :  { %vm24_vm0 = vcmp.eq.s32.totalorder %v23_v20, %v19_v23  ;;  %vm38_vm1 = vcmp.eq.s32.totalorder %v37_v22, %v19_v23 }
  0x76   :  { %v159_v28 = vsel %vm24_vm0, 1.0, %v223_v27  ;;  %v161_v31 = vsel %vm38_vm1, 1.0, %v223_v27 }
  0x7d   :  { %v30_v25 = vpop.permute.xlu0 %29  ;;  %v44_v26 = vpop.permute.xlu1 %43 }
  0x7e   :  { %vm31_vm2 = vcmp.eq.s32.totalorder %v30_v25, %v19_v23  ;;  %vm45_vm3 = vcmp.eq.s32.totalorder %v44_v26, %v19_v23 }
  0x7f   :  { %v160_v29 = vsel %vm31_vm2, 1.0, %v223_v27  ;;  %v162_v33 = vsel %vm45_vm3, 1.0, %v223_v27 }
  0x80   :  { %v34_v30 = vadd.f32 %v160_v29, %v159_v28 }
  0x82   :  { %v41_v32 = vadd.f32 %v161_v31, %v34_v30 }
  0x84   :  { %v48_v35 = vadd.f32 %v162_v33, %v41_v32 }
  0x86   :  { %v55_v37 = vadd.f32 %v163_v36, %v48_v35  ;;  %v65_v38 = vpop.permute.xlu1 %64 }
  0x87   :  { %vm66_vm7 = vcmp.eq.s32.totalorder %v65_v38, %v19_v23 }
  0x88   :  { %v62_v40 = vadd.f32 %v164_v39, %v55_v37  ;;  %v165_v41 = vsel %vm66_vm7, 1.0, %v223_v27 }
  0x8a   :  { %v69_v43 = vadd.f32 %v165_v41, %v62_v40 }
  0x8c   :  { %v76_v44 = vadd.f32 %v166_v42, %v69_v43 }
  0x8e   :  { %167 = vmatmul.msk.f32.vlgmr.msra.gmra.mxu0 %vm85_vm8, %v76_v44 }
 0x10b   :  { %v106_v47 = vpop.f32.mrf.mxu0 }
 0x10c   :  { %v109_v48 = vmul.f32 0.125, %v106_v47 }
 0x10e   :  { %168 = vmatmul.msk.f32.vlgmr.msra.gmra.mxu1 %vm118_vm9, %v109_v48 }
 0x18b   :  { %v139_v50 = vpop.f32.mrf.mxu1 }
 0x18c   :  { %v140_v51 = vadd.f32 %v188_v49, %v139_v50 }
 0x18e   :  { %142 = vst [vmem:[#allocation2] sm:$0xff] %v140_v51 }
 0x18f   :  { %153 = dma.vmem_to_hbm [thread:$0]  %s149_s16, 128, %s151_s18, [#allocation3]  }
 0x190   :  { %213 = dma.done.wait [#allocation3], 128  }
 0x191   :  { %214 = vsyncadd [#allocation3], 4294967168 }
 0x192   :  { %158 = vsyncpa [#allocation3], 1 }

</bundles_post_ra>
